<compile_context>
chip_gen: v7x
topology: tpu7x:2x2x1
jax: 0.10.0
libtpu: 0.0.40
codegen_flags: <defaults>
</compile_context>

<pallas_src>
import jax
import jax.numpy as jnp
from jax.experimental import pallas as pl
from jax.experimental.pallas import tpu as pltpu

LANE = 128
_EPS = 1e-5


def _round_up(x, m):
    return ((x + m - 1) // m) * m


def _pad_axis(x, target, axis):
    pad = target - x.shape[axis]
    if pad <= 0:
        return x
    widths = [(0, 0)] * x.ndim
    widths[axis] = (0, pad)
    return jnp.pad(x, widths)


# ----------------------------------------------------------------------------- kernel
def _mlp_kernel(z_ref, w1_ref, s1_ref, t1_ref,
                w2_ref, s2_ref, t2_ref,
                w3_ref, b3_ref, o_ref):
    """Fused Linear->BN->ReLU -> Linear->BN->ReLU -> Linear on one batch tile.

    Matmuls run in the weights' dtype (bf16 or f32) with f32 accumulation; the
    BN-folded scale/shift epilogue stays in f32.  Dropout = identity (eval mode).
    """
    cdt = w1_ref.dtype

    h1 = jnp.dot(z_ref[...], w1_ref[...], preferred_element_type=jnp.float32)
    h1 = jnp.maximum(h1 * s1_ref[...] + t1_ref[...], 0.0)

    h2 = jnp.dot(h1.astype(cdt), w2_ref[...], preferred_element_type=jnp.float32)
    h2 = jnp.maximum(h2 * s2_ref[...] + t2_ref[...], 0.0)

    out = jnp.dot(h2.astype(cdt), w3_ref[...],
                  preferred_element_type=jnp.float32) + b3_ref[...]
    o_ref[...] = out.astype(o_ref.dtype)


# ------------------------------------------------------------------- one-time parameter prep
def prepare_params(params, compute_dtype=jnp.bfloat16):
    """Fold BN into (scale, shift), transpose weights, zero-pad feature dims to 128,
    and cast weights to the matmul compute dtype.  Call ONCE."""
    def fold_bn(bias, gamma, beta, r_mean, r_var):
        scale = gamma / jnp.sqrt(r_var + _EPS)            # per-feature scale
        shift = beta - r_mean * scale + bias * scale      # absorbs linear bias
        return scale, shift

    s1, t1 = fold_bn(params["b1"], params["bn1_gamma"], params["bn1_beta"],
                     params["bn1_mean"], params["bn1_var"])
    s2, t2 = fold_bn(params["b2"], params["bn2_gamma"], params["bn2_beta"],
                     params["bn2_mean"], params["bn2_var"])

    w1 = params["w1"].T          # (K,  D2)
    w2 = params["w2"].T          # (D2, D4)
    w3 = params["w3"].T          # (D4, C)
    b3 = params["b3"]

    K, D2 = w1.shape
    D4 = w2.shape[1]
    C = w3.shape[1]
    Kp, D2p, D4p, Cp = (_round_up(d, LANE) for d in (K, D2, D4, C))

    # Zero padding is exact: padded weight cols/rows are zero, padded scale/shift are
    # zero, ReLU(0)=0, padded contraction rows multiply zero activations.
    w1p = _pad_axis(_pad_axis(w1, Kp, 0), D2p, 1).astype(compute_dtype)
    w2p = _pad_axis(_pad_axis(w2, D2p, 0), D4p, 1).astype(compute_dtype)
    w3p = _pad_axis(_pad_axis(w3, D4p, 0), Cp, 1).astype(compute_dtype)

    # Epilogue params stay f32 (accumulation dtype).
    s1p = _pad_axis(s1, D2p, 0)[None, :].astype(jnp.float32)
    t1p = _pad_axis(t1, D2p, 0)[None, :].astype(jnp.float32)
    s2p = _pad_axis(s2, D4p, 0)[None, :].astype(jnp.float32)
    t2p = _pad_axis(t2, D4p, 0)[None, :].astype(jnp.float32)
    b3p = _pad_axis(b3, Cp, 0)[None, :].astype(jnp.float32)

    return {
        "w1": w1p, "s1": s1p, "t1": t1p,
        "w2": w2p, "s2": s2p, "t2": t2p,
        "w3": w3p, "b3": b3p,
        "dims": (K, D2, D4, C),
        "padded_dims": (Kp, D2p, D4p, Cp),
        "compute_dtype": jnp.dtype(compute_dtype),
    }


# ----------------------------------------------------------------------- batch tile selection
def _choose_tm(B, sub=16, cap=1024):
    """Batch tile: multiple of `sub` (bf16 sublane packing), <= cap, balanced across
    grid steps, and >=2 steps whenever B allows (both v7x TensorCores get work)."""
    if B <= cap:
        if B >= 2 * sub:
            tm = _round_up(pl.cdiv(B, 2), sub)   # guarantee nb >= 2
        else:
            tm = _round_up(B, sub)
    else:
        nsteps = pl.cdiv(B, cap)
        tm = _round_up(pl.cdiv(B, nsteps), sub)  # balanced: last tile isn't mostly pad
    return min(tm, cap)


# ----------------------------------------------------------------------------- forward
def improved_classifier_forward(z, prep, out_dtype=None, slice_output=True):
    """Forward pass: one fused pallas_call over a batch-parallel grid.

    out_dtype defaults to the compute dtype (bf16 halves writeback traffic).
    With slice_output=False the padded (Bp, Cp) array is returned so the consumer
    can fold the [:B, :C] slice into its own op (avoids an extra HBM pass)."""
    B, K = z.shape
    K_, D2, D4, C = prep["dims"]
    Kp, D2p, D4p, Cp = prep["padded_dims"]
    assert K == K_, "latent_dim mismatch between input and prepared params"

    cdt = prep["compute_dtype"]
    out_dtype = jnp.dtype(out_dtype) if out_dtype is not None else cdt

    tm = _choose_tm(B)
    Bp = _round_up(B, tm)
    nb = Bp // tm

    # Pad + cast fused by XLA: one read of z, one write of the streamed (bf16) tile input.
    zp = _pad_axis(_pad_axis(z, Kp, 1), Bp, 0).astype(cdt)

    w1, s1, t1 = prep["w1"], prep["s1"], prep["t1"]
    w2, s2, t2 = prep["w2"], prep["s2"], prep["t2"]
    w3, b3 = prep["w3"], prep["b3"]

    # Weights/scales: full blocks with constant index_map -> VMEM-resident across steps.
    const_spec = lambda a: pl.BlockSpec(a.shape, lambda i: tuple(0 for _ in a.shape))

    in_specs = [
        pl.BlockSpec((tm, Kp), lambda i: (i, 0)),   # z tile (pipelined over batch)
        const_spec(w1), const_spec(s1), const_spec(t1),
        const_spec(w2), const_spec(s2), const_spec(t2),
        const_spec(w3), const_spec(b3),
    ]
    out_spec = pl.BlockSpec((tm, Cp), lambda i: (i, 0))   # lane-dense (Cp % 128 == 0)

    in_item = jnp.dtype(cdt).itemsize
    out_item = out_dtype.itemsize

    # VMEM budget from the actual working set (double-buffered tiles + resident weights).
    weight_bytes = sum(int(a.size) * a.dtype.itemsize
                       for a in (w1, s1, t1, w2, s2, t2, w3, b3))
    tile_bytes = (2 * tm * Kp * in_item          # double-buffered input tile
                  + 2 * tm * Cp * out_item        # double-buffered output tile
                  + 2 * tm * (D2p + D4p) * 4)     # f32 intermediates + cast copies
    vmem_limit = int(min(max(2 * weight_bytes + tile_bytes + (2 << 20), 4 << 20),
                         32 << 20))

    # Honest advisory estimate: padded dims, padded output writeback included.
    cost = pl.CostEstimate(
        flops=2 * Bp * (Kp * D2p + D2p * D4p + D4p * Cp),
        transcendentals=0,
        bytes_accessed=Bp * Kp * in_item + weight_bytes + Bp * Cp * out_item,
    )

    out = pl.pallas_call(
        _mlp_kernel,
        out_shape=jax.ShapeDtypeStruct((Bp, Cp), out_dtype),
        grid=(nb,),
        in_specs=in_specs,
        out_specs=out_spec,
        compiler_params=pltpu.CompilerParams(
            dimension_semantics=("parallel",),
            vmem_limit_bytes=vmem_limit,
        ),
        cost_estimate=cost,
    )(zp, w1, s1, t1, w2, s2, t2, w3, b3)

    if slice_output:
        return out[:B, :C]
    return out


# --------------------------------------------------------------------------- test harness
def make_params(key, latent_dim, num_classes):
    """Deterministic synthetic parameters matching nn.Linear / nn.BatchNorm1d shapes."""
    d2, d4 = latent_dim // 2, latent_dim // 4
    ks = jax.random.split(key, 6)

    def linear_init(kw, kb, fan_in, fan_out):
        bound = 1.0 / jnp.sqrt(fan_in)
        w = jax.random.uniform(kw, (fan_out, fan_in), jnp.float32, -bound, bound)
        b = jax.random.uniform(kb, (fan_out,), jnp.float32, -bound, bound)
        return w, b

    w1, b1 = linear_init(ks[0], ks[1], latent_dim, d2)
    w2, b2 = linear_init(ks[2], ks[3], d2, d4)
    w3, b3 = linear_init(ks[4], ks[5], d4, num_classes)

    return {
        "w1": w1, "b1": b1,
        "bn1_gamma": jnp.ones((d2,), jnp.float32) * 1.1,
        "bn1_beta": jnp.full((d2,), 0.05, jnp.float32),
        "bn1_mean": jnp.full((d2,), 0.02, jnp.float32),
        "bn1_var": jnp.ones((d2,), jnp.float32) * 0.9,
        "w2": w2, "b2": b2,
        "bn2_gamma": jnp.ones((d4,), jnp.float32) * 0.95,
        "bn2_beta": jnp.full((d4,), -0.03, jnp.float32),
        "bn2_mean": jnp.full((d4,), -0.01, jnp.float32),
        "bn2_var": jnp.ones((d4,), jnp.float32) * 1.2,
        "w3": w3, "b3": b3,
    }


def reference_forward(z, params):
    """Pure-JAX reference (eval-mode PyTorch semantics)."""
    def bn(x, g, b, m, v):
        return g * (x - m) / jnp.sqrt(v + _EPS) + b

    h = z @ params["w1"].T + params["b1"]
    h = jax.nn.relu(bn(h, params["bn1_gamma"], params["bn1_beta"],
                       params["bn1_mean"], params["bn1_var"]))
    h = h @ params["w2"].T + params["b2"]
    h = jax.nn.relu(bn(h, params["bn2_gamma"], params["bn2_beta"],
                       params["bn2_mean"], params["bn2_var"]))
    return h @ params["w3"].T + params["b3"]


if __name__ == "__main__":
    latent_dim = 128
    num_classes = 10
    batch = 8

    key = jax.random.PRNGKey(0)
    k_x, k_p = jax.random.split(key)
    z = jax.random.normal(k_x, (batch, latent_dim), dtype=jnp.float32)
    params = make_params(k_p, latent_dim, num_classes)
    ref = reference_forward(z, params)

    # Fast path: bf16 weights/activations/output, f32 accumulation + epilogue.
    prep_bf16 = prepare_params(params, compute_dtype=jnp.bfloat16)
    out_bf16 = improved_classifier_forward(z, prep_bf16)
    out_bf16 = jax.block_until_ready(out_bf16)
    assert out_bf16.shape == (batch, num_classes)
    assert jnp.allclose(out_bf16.astype(jnp.float32), ref, atol=5e-2, rtol=5e-2), \
        "bf16 path mismatch vs JAX reference"

    # Validation path: full f32, tight tolerance.
    prep_f32 = prepare_params(params, compute_dtype=jnp.float32)
    out_f32 = improved_classifier_forward(z, prep_f32, out_dtype=jnp.float32)
    out_f32 = jax.block_until_ready(out_f32)
    assert out_f32.shape == (batch, num_classes)
    assert jnp.allclose(out_f32, ref, atol=1e-4, rtol=1e-4), \
        "f32 path mismatch vs JAX reference"

    print("KERNEL_OK")
</pallas_src>

<mosaic_0001>
module attributes {stable_mosaic.version = 11 : i64} {
  func.func @_mlp_kernel(%arg0: i32, %arg1: memref<16x128xbf16, #tpu.memory_space<vmem>>, %arg2: memref<128x128xbf16, #tpu.memory_space<vmem>>, %arg3: memref<1x128xf32, #tpu.memory_space<vmem>>, %arg4: memref<1x128xf32, #tpu.memory_space<vmem>>, %arg5: memref<128x128xbf16, #tpu.memory_space<vmem>>, %arg6: memref<1x128xf32, #tpu.memory_space<vmem>>, %arg7: memref<1x128xf32, #tpu.memory_space<vmem>>, %arg8: memref<128x128xbf16, #tpu.memory_space<vmem>>, %arg9: memref<1x128xf32, #tpu.memory_space<vmem>>, %arg10: memref<16x128xbf16, #tpu.memory_space<vmem>>) attributes {dimension_semantics = [#tpu.dimension_semantics<parallel>], iteration_bounds = array<i64: 1>, scalar_prefetch = 0 : i64, scratch_operands = 0 : i64, tpu.core_type = #tpu.core_type<tc>, window_params = [{transform_indices = @transform_0, window_bounds = array<i64: 16, 128>}, {pipeline_mode = #tpu.pipeline_mode<synchronous>, transform_indices = @transform_1, window_bounds = array<i64: 128, 128>}, {pipeline_mode = #tpu.pipeline_mode<synchronous>, transform_indices = @transform_2, window_bounds = array<i64: 1, 128>}, {pipeline_mode = #tpu.pipeline_mode<synchronous>, transform_indices = @transform_3, window_bounds = array<i64: 1, 128>}, {pipeline_mode = #tpu.pipeline_mode<synchronous>, transform_indices = @transform_4, window_bounds = array<i64: 128, 128>}, {pipeline_mode = #tpu.pipeline_mode<synchronous>, transform_indices = @transform_5, window_bounds = array<i64: 1, 128>}, {pipeline_mode = #tpu.pipeline_mode<synchronous>, transform_indices = @transform_6, window_bounds = array<i64: 1, 128>}, {pipeline_mode = #tpu.pipeline_mode<synchronous>, transform_indices = @transform_7, window_bounds = array<i64: 128, 128>}, {pipeline_mode = #tpu.pipeline_mode<synchronous>, transform_indices = @transform_8, window_bounds = array<i64: 1, 128>}, {transform_indices = @transform_9, window_bounds = array<i64: 16, 128>}]} {
    %c0 = arith.constant 0 : index
    %c0_0 = arith.constant 0 : index
    %0 = vector.load %arg1[%c0, %c0_0] : memref<16x128xbf16, #tpu.memory_space<vmem>>, vector<16x128xbf16>
    %c0_1 = arith.constant 0 : index
    %c0_2 = arith.constant 0 : index
    %1 = vector.load %arg2[%c0_1, %c0_2] : memref<128x128xbf16, #tpu.memory_space<vmem>>, vector<128x128xbf16>
    %cst = arith.constant dense<0.000000e+00> : vector<16x128xf32>
    %2 = tpu.matmul %0, %1, %cst {dimension_numbers = #tpu.dot_dimension_numbers<[1], [0], [0], [1], [0, 0, 1, 1], [], []>} : vector<16x128xbf16>, vector<128x128xbf16>, vector<16x128xf32> -> vector<16x128xf32>
    %c0_3 = arith.constant 0 : index
    %c0_4 = arith.constant 0 : index
    %3 = vector.load %arg3[%c0_3, %c0_4] : memref<1x128xf32, #tpu.memory_space<vmem>>, vector<1x128xf32>
    %4 = vector.broadcast %3 : vector<1x128xf32> to vector<16x128xf32>
    %5 = arith.mulf %2, %4 : vector<16x128xf32>
    %c0_5 = arith.constant 0 : index
    %c0_6 = arith.constant 0 : index
    %6 = vector.load %arg4[%c0_5, %c0_6] : memref<1x128xf32, #tpu.memory_space<vmem>>, vector<1x128xf32>
    %7 = vector.broadcast %6 : vector<1x128xf32> to vector<16x128xf32>
    %8 = arith.addf %5, %7 : vector<16x128xf32>
    %cst_7 = arith.constant 0.000000e+00 : f32
    %9 = vector.broadcast %cst_7 : f32 to vector<16x128xf32>
    %10 = arith.maximumf %8, %9 : vector<16x128xf32>
    %11 = arith.truncf %10 : vector<16x128xf32> to vector<16x128xbf16>
    %c0_8 = arith.constant 0 : index
    %c0_9 = arith.constant 0 : index
    %12 = vector.load %arg5[%c0_8, %c0_9] : memref<128x128xbf16, #tpu.memory_space<vmem>>, vector<128x128xbf16>
    %cst_10 = arith.constant dense<0.000000e+00> : vector<16x128xf32>
    %13 = tpu.matmul %11, %12, %cst_10 {dimension_numbers = #tpu.dot_dimension_numbers<[1], [0], [0], [1], [0, 0, 1, 1], [], []>} : vector<16x128xbf16>, vector<128x128xbf16>, vector<16x128xf32> -> vector<16x128xf32>
    %c0_11 = arith.constant 0 : index
    %c0_12 = arith.constant 0 : index
    %14 = vector.load %arg6[%c0_11, %c0_12] : memref<1x128xf32, #tpu.memory_space<vmem>>, vector<1x128xf32>
    %15 = vector.broadcast %14 : vector<1x128xf32> to vector<16x128xf32>
    %16 = arith.mulf %13, %15 : vector<16x128xf32>
    %c0_13 = arith.constant 0 : index
    %c0_14 = arith.constant 0 : index
    %17 = vector.load %arg7[%c0_13, %c0_14] : memref<1x128xf32, #tpu.memory_space<vmem>>, vector<1x128xf32>
    %18 = vector.broadcast %17 : vector<1x128xf32> to vector<16x128xf32>
    %19 = arith.addf %16, %18 : vector<16x128xf32>
    %cst_15 = arith.constant 0.000000e+00 : f32
    %20 = vector.broadcast %cst_15 : f32 to vector<16x128xf32>
    %21 = arith.maximumf %19, %20 : vector<16x128xf32>
    %22 = arith.truncf %21 : vector<16x128xf32> to vector<16x128xbf16>
    %c0_16 = arith.constant 0 : index
    %c0_17 = arith.constant 0 : index
    %23 = vector.load %arg8[%c0_16, %c0_17] : memref<128x128xbf16, #tpu.memory_space<vmem>>, vector<128x128xbf16>
    %cst_18 = arith.constant dense<0.000000e+00> : vector<16x128xf32>
    %24 = tpu.matmul %22, %23, %cst_18 {dimension_numbers = #tpu.dot_dimension_numbers<[1], [0], [0], [1], [0, 0, 1, 1], [], []>} : vector<16x128xbf16>, vector<128x128xbf16>, vector<16x128xf32> -> vector<16x128xf32>
    %c0_19 = arith.constant 0 : index
    %c0_20 = arith.constant 0 : index
    %25 = vector.load %arg9[%c0_19, %c0_20] : memref<1x128xf32, #tpu.memory_space<vmem>>, vector<1x128xf32>
    %26 = vector.broadcast %25 : vector<1x128xf32> to vector<16x128xf32>
    %27 = arith.addf %24, %26 : vector<16x128xf32>
    %28 = arith.truncf %27 : vector<16x128xf32> to vector<16x128xbf16>
    %c0_21 = arith.constant 0 : index
    %c0_22 = arith.constant 0 : index
    %29 = vector.load %arg10[%c0_21, %c0_22] : memref<16x128xbf16, #tpu.memory_space<vmem>>, vector<16x128xbf16>
    tpu.vector_store %arg10[%c0_21, %c0_22], %28 {strides = array<i32>} : memref<16x128xbf16, #tpu.memory_space<vmem>>, vector<16x128xbf16>,
    return
  }
  func.func @transform_0(%arg0: i32) -> (i32, i32) {
    %c0_i32 = arith.constant 0 : i32
    %c0_i32_0 = arith.constant 0 : i32
    return %arg0, %c0_i32 : i32, i32
  }
  func.func @transform_1(%arg0: i32) -> (i32, i32) {
    %c0_i32 = arith.constant 0 : i32
    %c0_i32_0 = arith.constant 0 : i32
    %c0_i32_1 = arith.constant 0 : i32
    return %c0_i32, %c0_i32_0 : i32, i32
  }
  func.func @transform_2(%arg0: i32) -> (i32, i32) {
    %c0_i32 = arith.constant 0 : i32
    %c0_i32_0 = arith.constant 0 : i32
    %c0_i32_1 = arith.constant 0 : i32
    return %c0_i32, %c0_i32_0 : i32, i32
  }
  func.func @transform_3(%arg0: i32) -> (i32, i32) {
    %c0_i32 = arith.constant 0 : i32
    %c0_i32_0 = arith.constant 0 : i32
    %c0_i32_1 = arith.constant 0 : i32
    return %c0_i32, %c0_i32_0 : i32, i32
  }
  func.func @transform_4(%arg0: i32) -> (i32, i32) {
    %c0_i32 = arith.constant 0 : i32
    %c0_i32_0 = arith.constant 0 : i32
    %c0_i32_1 = arith.constant 0 : i32
    return %c0_i32, %c0_i32_0 : i32, i32
  }
  func.func @transform_5(%arg0: i32) -> (i32, i32) {
    %c0_i32 = arith.constant 0 : i32
    %c0_i32_0 = arith.constant 0 : i32
    %c0_i32_1 = arith.constant 0 : i32
    return %c0_i32, %c0_i32_0 : i32, i32
  }
  func.func @transform_6(%arg0: i32) -> (i32, i32) {
    %c0_i32 = arith.constant 0 : i32
    %c0_i32_0 = arith.constant 0 : i32
    %c0_i32_1 = arith.constant 0 : i32
    return %c0_i32, %c0_i32_0 : i32, i32
  }
  func.func @transform_7(%arg0: i32) -> (i32, i32) {
    %c0_i32 = arith.constant 0 : i32
    %c0_i32_0 = arith.constant 0 : i32
    %c0_i32_1 = arith.constant 0 : i32
    return %c0_i32, %c0_i32_0 : i32, i32
  }
  func.func @transform_8(%arg0: i32) -> (i32, i32) {
    %c0_i32 = arith.constant 0 : i32
    %c0_i32_0 = arith.constant 0 : i32
    %c0_i32_1 = arith.constant 0 : i32
    return %c0_i32, %c0_i32_0 : i32, i32
  }
  func.func @transform_9(%arg0: i32) -> (i32, i32) {
    %c0_i32 = arith.constant 0 : i32
    %c0_i32_0 = arith.constant 0 : i32
    return %arg0, %c0_i32 : i32, i32
  }
}

</mosaic_0001>

<bundles_post_ra>
// kernel: tpu_custom_call.1
= control target key start
LH: loop header
LB: loop body
LE: loop exit
PB: predicated region body
PF: predicated region fallthrough
CT: control target
= control target key end

     0   :  { %14 = vsyncpa [#allocation3], 0  ;;  %s961_s0 = inlined_call_operand.hbm [shape: bf16[16,128], index: 0, kind: input, shape index: {}]   ;;  %s962_s1 = inlined_call_operand.hbm [shape: bf16[128,128], index: 1, kind: input, shape index: {}]   ;;  %s963_s2 = inlined_call_operand.vmem [shape: f32[1,128], index: 2, kind: input, shape index: {}]   ;;  %s964_s3 = inlined_call_operand.vmem [shape: f32[1,128], index: 3, kind: input, shape index: {}]   ;;  %s965_s4 = inlined_call_operand.hbm [shape: bf16[128,128], index: 4, kind: input, shape index: {}]   ;;  %s966_s5 = inlined_call_operand.vmem [shape: f32[1,128], index: 5, kind: input, shape index: {}]   ;;  %s967_s6 = inlined_call_operand.vmem [shape: f32[1,128], index: 6, kind: input, shape index: {}]   ;;  %s968_s7 = inlined_call_operand.hbm [shape: bf16[128,128], index: 7, kind: input, shape index: {}]   ;;  %s969_s8 = inlined_call_operand.vmem [shape: f32[1,128], index: 8, kind: input, shape index: {}]   ;;  %s970_s9 = inlined_call_operand.hbm [shape: bf16[16,128], index: 9, kind: output, shape index: {}]  }
   0x1   :  { %15 = vsyncpa [#allocation6], 0 }
   0x2   :  { %16 = vsyncpa [#allocation9], 0 }
   0x3   :  { %17 = vsyncpa [#allocation4], 0  ;;  %s768_s30 = smov [#allocation5]   ;;  %s769_s11 = smov [#allocation2]  }
   0x4   :  { %s35_s10 = sshll.u32 %s768_s30, 4  ;;  %s23_s12 = sshll.u32 %s769_s11, 4  ;;  %s36_s10 = int_to_ptr.vmem [resolvable:$true] %s35_s10  ;;  %s827_s12 = int_to_ptr.vmem [resolvable:$true] %s23_s12 }
   0x5   :  { %s650_s15 = scalar_lea.hbm %s962_s1, 1024 }
   0x6   :  { %p651_p0 = scmp.ne.s32.totalorder %s962_s1, %s650_s15  ;;  %p654_p1 = scmp.lt.u32.totalorder %s650_s15, %s962_s1 }
   0x8   :  { %p656_p2 = pnand %p654_p1, %p651_p0 }
   0xa   :  { %659 = shalt.err (!%p656_p2)
}
   0xb   :  { %s660_s20 = scalar_lea.vmem %s36_s10, 1024  ;;  %p665_p4 = scmp.lt.s32.totalorder %s36_s10, %s36_s10 }
   0xc   :  { %p661_p3 = scmp.ne.s32.totalorder %s36_s10, %s660_s20  ;;  %p666_p5 = scmp.lt.s32.totalorder %s660_s20, %s660_s20 }
   0xe   :  { %p667_p6 = por %p666_p5, %p665_p4 }
  0x10   :  { %p668_p7 = pnand %p667_p6, %p661_p3 }
  0x12   :  { %671 = shalt.err (!%p668_p7)
}
  0x13   :  { %s770_s21 = smov 64   ;;  %s771_s22 = smov 4  }
  0x14   :  { %41 = dma.hbm_to_vmem [thread:$0]  %s962_s1, 1024, %s36_s10, [#allocation6], %s770_s21, %s770_s21, %s771_s22  }
  0x15   :  { %s672_s27 = scalar_lea.hbm %s961_s0, 128 }
  0x16   :  { %p673_p8 = scmp.ne.s32.totalorder %s961_s0, %s672_s27  ;;  %p676_p9 = scmp.lt.u32.totalorder %s672_s27, %s961_s0 }
  0x18   :  { %p678_p10 = pnand %p676_p9, %p673_p8 }
  0x1a   :  { %681 = shalt.err (!%p678_p10)
}
  0x1b   :  { %s682_s13 = scalar_lea.vmem %s827_s12, 128  ;;  %p687_p12 = scmp.lt.s32.totalorder %s827_s12, %s827_s12 }
  0x1c   :  { %p683_p11 = scmp.ne.s32.totalorder %s827_s12, %s682_s13  ;;  %p688_p13 = scmp.lt.s32.totalorder %s682_s13, %s682_s13 }
  0x1e   :  { %p689_p0 = por %p688_p13, %p687_p12 }
  0x20   :  { %p690_p1 = pnand %p689_p0, %p683_p11 }
  0x22   :  { %693 = shalt.err (!%p690_p1)
}
  0x23   :  { %29 = dma.hbm_to_vmem [thread:$0]  %s961_s0, 128, %s827_s12, [#allocation3], %s770_s21, %s770_s21, %s771_s22  }
  0x24   :  { %s772_s14 = smov [#allocation7]   ;;  %s773_s16 = smov [#allocation8]  }
  0x25   :  { %s51_s15 = sshll.u32 %s772_s14, 4  ;;  %s67_s17 = sshll.u32 %s773_s16, 4  ;;  %s52_s15 = int_to_ptr.vmem [resolvable:$true] %s51_s15  ;;  %s864_s17 = int_to_ptr.vmem [resolvable:$true] %s67_s17 }
  0x26   :  { %s694_s20 = scalar_lea.hbm %s965_s4, 1024 }
  0x27   :  { %p695_p2 = scmp.ne.s32.totalorder %s965_s4, %s694_s20  ;;  %p698_p3 = scmp.lt.u32.totalorder %s694_s20, %s965_s4 }
  0x29   :  { %p700_p4 = pnand %p698_p3, %p695_p2 }
  0x2b   :  { %703 = shalt.err (!%p700_p4)
}
  0x2c   :  { %s704_s0 = scalar_lea.vmem %s52_s15, 1024  ;;  %p709_p6 = scmp.lt.s32.totalorder %s52_s15, %s52_s15 }
  0x2d   :  { %p705_p5 = scmp.ne.s32.totalorder %s52_s15, %s704_s0  ;;  %p710_p7 = scmp.lt.s32.totalorder %s704_s0, %s704_s0 }
  0x2f   :  { %p711_p8 = por %p710_p7, %p709_p6 }
  0x31   :  { %p712_p9 = pnand %p711_p8, %p705_p5 }
  0x33   :  { %715 = shalt.err (!%p712_p9)
}
  0x34   :  { %57 = dma.hbm_to_vmem [thread:$0]  %s965_s4, 1024, %s52_s15, [#allocation6], %s770_s21, %s770_s21, %s771_s22  }
  0x35   :  { %s716_s30 = scalar_lea.hbm %s968_s7, 1024 }
  0x36   :  { %p717_p10 = scmp.ne.s32.totalorder %s968_s7, %s716_s30  ;;  %p720_p11 = scmp.lt.u32.totalorder %s716_s30, %s968_s7 }
  0x38   :  { %p722_p12 = pnand %p720_p11, %p717_p10 }
  0x3a   :  { %725 = shalt.err (!%p722_p12)
}
  0x3b   :  { %s726_s14 = scalar_lea.vmem %s864_s17, 1024  ;;  %p731_p0 = scmp.lt.s32.totalorder %s864_s17, %s864_s17 }
  0x3c   :  { %p727_p13 = scmp.ne.s32.totalorder %s864_s17, %s726_s14  ;;  %p732_p1 = scmp.lt.s32.totalorder %s726_s14, %s726_s14 }
  0x3e   :  { %p733_p2 = por %p732_p1, %p731_p0 }
  0x40   :  { %p734_p3 = pnand %p733_p2, %p727_p13 }
  0x42   :  { %737 = shalt.err (!%p734_p3)
}
  0x43   :  { %73 = dma.hbm_to_vmem [thread:$0]  %s968_s7, 1024, %s864_s17, [#allocation9], %s770_s21, %s770_s21, %s771_s22  }
  0x44   :  { %760 = dma.done.wait [#allocation3], 128  }
  0x45   :  { %761 = vsyncadd [#allocation3], 4294967168 }
  0x46   :  { %762 = dma.done.wait [#allocation6], 2048  }
  0x47   :  { %763 = vsyncadd [#allocation6], 4294965248 }
  0x48   :  { %764 = dma.done.wait [#allocation9], 1024  }
  0x49   :  { %765 = vsyncadd [#allocation9], 4294966272  ;;  %v774_v0 = vmov 0.0   ;;  %vm775_vm0 = vmmov 0   ;;  %v625_v1 = vld [vmem:[#allocation5] sm:$0xff]   ;;  %v626_v2 = vld [vmem:[#allocation5 + $0x8] sm:$0xff]  }
  0x4a   :  { %556 = vmatprep.subr.bf16.mxu0 %v774_v0  ;;  %572 = vmatprep.mubr.msk.bf16.mxu0 %vm775_vm0, %v774_v0  ;;  %v627_v3 = vld [vmem:[#allocation5 + $0x10] sm:$0xff]   ;;  %v634_v4 = vld [vmem:[#allocation7] sm:$0xff]   ;;  %v628_v5 = vld [vmem:[#allocation5 + $0x18] sm:$0xff]  }
  0x4b   :  { %576 = vmatprep.subr.bf16.mxu1 %v774_v0  ;;  %592 = vmatprep.mubr.msk.bf16.mxu1 %vm775_vm0, %v774_v0  ;;  %v635_v6 = vld [vmem:[#allocation7 + $0x8] sm:$0xff]   ;;  %v629_v7 = vld [vmem:[#allocation5 + $0x20] sm:$0xff]   ;;  %v636_v8 = vld [vmem:[#allocation7 + $0x10] sm:$0xff]  }
  0x4c   :  { %557 = vmatpush3.bf16.msra.mxu0 %v625_v1  ;;  %577 = vmatpush3.bf16.msra.mxu1 %v634_v4  ;;  %v630_v9 = vld [vmem:[#allocation5 + $0x28] sm:$0xff]   ;;  %v637_v10 = vld [vmem:[#allocation7 + $0x18] sm:$0xff]   ;;  %v631_v11 = vld [vmem:[#allocation5 + $0x30] sm:$0xff]  }
  0x4d   :  { %558 = vmatprep.subr.bf16.mxu0 %v774_v0  ;;  %578 = vmatprep.subr.bf16.mxu1 %v774_v0  ;;  %v638_v12 = vld [vmem:[#allocation7 + $0x20] sm:$0xff]   ;;  %v632_v13 = vld [vmem:[#allocation5 + $0x38] sm:$0xff]   ;;  %v639_v15 = vld [vmem:[#allocation7 + $0x28] sm:$0xff]  }
  0x4e   :  { %v633_v14 = vld [vmem:[#allocation2] sm:$0xff]   ;;  %v640_v16 = vld [vmem:[#allocation7 + $0x30] sm:$0xff]   ;;  %v642_v18 = vld [vmem:[#allocation8] sm:$0xff]  }
  0x4f   :  { %v641_v17 = vld [vmem:[#allocation7 + $0x38] sm:$0xff]   ;;  %v643_v19 = vld [vmem:[#allocation8 + $0x8] sm:$0xff]   ;;  %v644_v20 = vld [vmem:[#allocation8 + $0x10] sm:$0xff]  }
  0x50   :  { %559 = vmatpush3.bf16.msra.mxu0 %v626_v2  ;;  %579 = vmatpush3.bf16.msra.mxu1 %v635_v6  ;;  %v645_v21 = vld [vmem:[#allocation8 + $0x18] sm:$0xff]   ;;  %v646_v22 = vld [vmem:[#allocation8 + $0x20] sm:$0xff]   ;;  %v647_v36 = vld [vmem:[#allocation8 + $0x28] sm:$0xff]  }
  0x51   :  { %560 = vmatprep.subr.bf16.mxu0 %v774_v0  ;;  %580 = vmatprep.subr.bf16.mxu1 %v774_v0  ;;  %v499_v23 = vld [vmem:[%s963_s2] ss:$0 sm:$0xff]  ;;  %v648_v37 = vld [vmem:[#allocation8 + $0x30] sm:$0xff]  }
  0x52   :  { %v500_v25 = vld [vmem:[%s964_s3] ss:$0 sm:$0xff] }
  0x53   :  { %v649_v38 = vld [vmem:[#allocation8 + $0x38] sm:$0xff]  }
  0x54   :  { %561 = vmatpush3.bf16.msra.mxu0 %v627_v3  ;;  %581 = vmatpush3.bf16.msra.mxu1 %v636_v8  ;;  %v509_v39 = vld [vmem:[%s966_s5] ss:$0 sm:$0xff]  ;;  %s776_s5 = smov [#allocation10]  }
  0x55   :  { %562 = vmatprep.subr.bf16.mxu0 %v774_v0  ;;  %582 = vmatprep.subr.bf16.mxu1 %v774_v0  ;;  %v510_v41 = vld [vmem:[%s967_s6] ss:$0 sm:$0xff]  ;;  %s476_s6 = sshll.u32 %s776_s5, 4  ;;  %s477_s6 = int_to_ptr.vmem [resolvable:$true] %s476_s6 }
  0x56   :  { %v511_v52 = vld [vmem:[%s969_s8] ss:$0 sm:$0xff]  ;;  %s738_s25 = scalar_lea.vmem %s477_s6, 128  ;;  %p743_p5 = scmp.lt.s32.totalorder %s477_s6, %s477_s6 }
  0x57   :  { %p739_p4 = scmp.ne.s32.totalorder %s477_s6, %s738_s25  ;;  %p744_p6 = scmp.lt.s32.totalorder %s738_s25, %s738_s25 }
  0x58   :  { %563 = vmatpush3.bf16.msra.mxu0 %v628_v5  ;;  %583 = vmatpush3.bf16.msra.mxu1 %v637_v10 }
  0x59   :  { %564 = vmatprep.subr.bf16.mxu0 %v774_v0  ;;  %584 = vmatprep.subr.bf16.mxu1 %v774_v0  ;;  %p745_p7 = por %p744_p6, %p743_p5 }
  0x5b   :  { %p746_p8 = pnand %p745_p7, %p739_p4 }
  0x5c   :  { %565 = vmatpush3.bf16.msra.mxu0 %v629_v7  ;;  %585 = vmatpush3.bf16.msra.mxu1 %v638_v12 }
  0x5d   :  { %566 = vmatprep.subr.bf16.mxu0 %v774_v0  ;;  %586 = vmatprep.subr.bf16.mxu1 %v774_v0 }
  0x60   :  { %567 = vmatpush3.bf16.msra.mxu0 %v630_v9  ;;  %587 = vmatpush3.bf16.msra.mxu1 %v639_v15 }
  0x61   :  { %568 = vmatprep.subr.bf16.mxu0 %v774_v0  ;;  %588 = vmatprep.subr.bf16.mxu1 %v774_v0 }
  0x64   :  { %569 = vmatpush3.bf16.msra.mxu0 %v631_v11  ;;  %589 = vmatpush3.bf16.msra.mxu1 %v640_v16 }
  0x65   :  { %570 = vmatprep.subr.bf16.mxu0 %v774_v0  ;;  %590 = vmatprep.subr.bf16.mxu1 %v774_v0 }
  0x68   :  { %571 = vmatpush3.bf16.msra.mxu0 %v632_v13  ;;  %591 = vmatpush3.bf16.msra.mxu1 %v641_v17 }
  0x69   :  { %596 = vmatprep.subr.bf16.mxu0 %v774_v0 }
  0x6b   :  { %573 = vmatmul.mubr.bf16.vlgmr.msra.gmra.mrb[0].mxu0 %v633_v14 }
  0x6c   :  { %612 = vmatprep.mubr.msk.bf16.mxu0 %vm775_vm0, %v774_v0  ;;  %597 = vmatpush3.bf16.msra.mxu0 %v642_v18 }
  0x6d   :  { %598 = vmatprep.subr.bf16.mxu0 %v774_v0 }
  0x70   :  { %599 = vmatpush3.bf16.msra.mxu0 %v643_v19 }
  0x71   :  { %600 = vmatprep.subr.bf16.mxu0 %v774_v0 }
  0x74   :  { %601 = vmatpush3.bf16.msra.mxu0 %v644_v20 }
  0x75   :  { %602 = vmatprep.subr.bf16.mxu0 %v774_v0 }
  0x78   :  { %603 = vmatpush3.bf16.msra.mxu0 %v645_v21 }
  0x79   :  { %604 = vmatprep.subr.bf16.mxu0 %v774_v0 }
  0x7c   :  { %605 = vmatpush3.bf16.msra.mxu0 %v646_v22 }
  0x7d   :  { %606 = vmatprep.subr.bf16.mxu0 %v774_v0 }
  0x80   :  { %607 = vmatpush3.bf16.msra.mxu0 %v647_v36 }
  0x81   :  { %608 = vmatprep.subr.bf16.mxu0 %v774_v0 }
  0x84   :  { %609 = vmatpush3.bf16.msra.mxu0 %v648_v37 }
  0x85   :  { %610 = vmatprep.subr.bf16.mxu0 %v774_v0 }
  0x88   :  { %611 = vmatpush3.bf16.msra.mxu0 %v649_v38 }
 0x13e   :  { %v195_v24 = vpop.f32.mrb[0].mxu0 }
 0x13f   :  { %v209_v26 = vmul.f32 %v499_v23, %v195_v24  ;;  %v574_v27 = vpop.f32.mrb[1].mxu0 }
 0x140   :  { %v198_v28 = vpop.f32.mrb[2].mxu0 }
 0x141   :  { %v218_v29 = vadd.f32 %v500_v25, %v209_v26  ;;  %v210_v30 = vmul.f32 %v499_v23, %v198_v28  ;;  %v575_v31 = vpop.f32.mrb[3].mxu0 }
 0x143   :  { %v219_v32 = vadd.f32 %v500_v25, %v210_v30  ;;  %v220_v33 = vmax.f32 %v218_v29, 0.0 }
 0x145   :  { %v221_v34 = vmax.f32 %v219_v32, 0.0 }
 0x147   :  { %v222_v35 = vpack.c.bf16 %v221_v34, %v220_v33 }
 0x149   :  { %593 = vmatmul.mubr.bf16.vlgmr.msra.gmra.mrb[0].mxu1 %v222_v35 }
 0x21c   :  { %v321_v40 = vpop.f32.mrb[0].mxu1 }
 0x21d   :  { %v335_v42 = vmul.f32 %v509_v39, %v321_v40  ;;  %v594_v43 = vpop.f32.mrb[1].mxu1 }
 0x21e   :  { %v324_v44 = vpop.f32.mrb[2].mxu1 }
 0x21f   :  { %v344_v45 = vadd.f32 %v510_v41, %v335_v42  ;;  %v336_v46 = vmul.f32 %v509_v39, %v324_v44  ;;  %v595_v47 = vpop.f32.mrb[3].mxu1 }
 0x221   :  { %v345_v48 = vadd.f32 %v510_v41, %v336_v46  ;;  %v346_v49 = vmax.f32 %v344_v45, 0.0 }
 0x223   :  { %v347_v50 = vmax.f32 %v345_v48, 0.0 }
 0x225   :  { %v348_v51 = vpack.c.bf16 %v347_v50, %v346_v49 }
 0x227   :  { %613 = vmatmul.mubr.bf16.vlgmr.msra.gmra.mrb[4].mxu0 %v348_v51 }
 0x2fa   :  { %v454_v53 = vpop.f32.mrb[4].mxu0 }
 0x2fb   :  { %v614_v54 = vpop.f32.mrb[5].mxu0  ;;  %v455_v56 = vadd.f32 %v511_v52, %v454_v53 }
 0x2fc   :  { %v457_v55 = vpop.f32.mrb[6].mxu0 }
 0x2fd   :  { %v458_v57 = vadd.f32 %v511_v52, %v457_v55  ;;  %v615_v58 = vpop.f32.mrb[7].mxu0 }
 0x2ff   :  { %v527_v59 = vpack.c.bf16 %v458_v57, %v455_v56 }
 0x301   :  { %528 = vst [vmem:[#allocation10] sm:$0xff] %v527_v59  }
 0x302   :  { %749 = shalt.err (!%p746_p8)
}
 0x303   :  { %s750_s0 = scalar_lea.hbm %s970_s9, 128 }
 0x304   :  { %p751_p9 = scmp.ne.s32.totalorder %s970_s9, %s750_s0  ;;  %p754_p10 = scmp.lt.u32.totalorder %s750_s0, %s970_s9 }
 0x306   :  { %p756_p11 = pnand %p754_p10, %p751_p9 }
 0x308   :  { %759 = shalt.err (!%p756_p11)
}
 0x309   :  { %482 = dma.vmem_to_hbm [thread:$0]  %s477_s6, 128, %s970_s9, [#allocation4], %s770_s21, %s770_s21, %s771_s22  }
 0x30a   :  { %766 = dma.done.wait [#allocation4], 128  }
 0x30b   :  { %767 = vsyncadd [#allocation4], 4294967168 }
 0x30c   :  { %486 = vsyncpa [#allocation3], 1 }
 0x30d   :  { %487 = vsyncpa [#allocation6], 1 }
 0x30e   :  { %488 = vsyncpa [#allocation9], 1 }
 0x30f   :  { %489 = vsyncpa [#allocation4], 1 }

</bundles_post_ra>
